<compile_context>
chip_gen: v6e
topology: v6e:2x2x1
jax: 0.10.0
libtpu: 0.0.40
codegen_flags: <defaults>
</compile_context>

<pallas_src>
import functools

import jax
import jax.numpy as jnp
from jax.experimental import pallas as pl
from jax.experimental.pallas import tpu as pltpu


def _se_kernel(x_ref, w1_ref, b1_ref, w2_ref, b2_ref, out1_ref, out2_ref, *,
               inv_hw):
    # x_ref: (Nt, C, HW) in the input dtype.
    # w1_ref: (C, hidden), b1_ref: (1, hidden), w2_ref: (hidden, C), b2_ref: (1, C)
    x = x_ref[...]  # keep in input dtype; do NOT upcast the big tile

    # Global average pool over the flattened spatial (lane) axis.
    # Accumulate in f32; zero rows from batch padding contribute 0 and are
    # sliced off in the wrapper.
    gap = jnp.sum(x.astype(jnp.float32), axis=-1) * inv_hw          # (Nt, C)

    # Linear 1 (pre-ReLU -> this IS output1, matching PyTorch part1).
    s1 = jnp.dot(gap, w1_ref[...], preferred_element_type=jnp.float32) + b1_ref[...]
    out1_ref[...] = s1.astype(out1_ref.dtype)

    # ReLU -> Linear 2 -> Sigmoid gate.
    h = jnp.maximum(s1, 0.0)
    s2 = jnp.dot(h, w2_ref[...], preferred_element_type=jnp.float32) + b2_ref[...]
    gate = jax.nn.sigmoid(s2).astype(x.dtype)                        # (Nt, C)

    # Channel-wise rescale in the input dtype.
    out2_ref[...] = x * gate[:, :, None]


def _round_up(a, b):
    return ((a + b - 1) // b) * b


def _choose_batch_tile(N, C, HW, itemsize, budget_bytes):
    # Per grid step: 2 double-buffered x tiles + 2 double-buffered out2 tiles.
    per_sample = 4 * C * HW * itemsize
    max_nt = max(int(budget_bytes // max(per_sample, 1)), 1)
    target = _round_up(max(N, 1), 8)  # at least 8, sublane-aligned
    if max_nt >= 8:
        nt = min((max_nt // 8) * 8, target)
    else:
        # TODO(synk): a single sample's (C, H*W) slab nearly fills the VMEM
        # budget; an inner pltpu.emit_pipeline over H*W chunks would be needed
        # for good tiles here. Fall back to the largest batch tile that fits.
        nt = min(max_nt, max(N, 1))
    return max(nt, 1)


def seq_ex_block(x, w1, b1, w2, b2, *, vmem_tile_budget_bytes=24 << 20):
    """x: (N, C, H, W). w1: (hidden, C), b1: (hidden,), w2: (C, hidden),
       b2: (C,) -- PyTorch nn.Linear layout."""
    N, C, H, W = x.shape
    hidden = w1.shape[0]
    HW = H * W
    itemsize = x.dtype.itemsize

    # Batch tile (multiple of 8 when possible), pad N so the grid divides evenly.
    Nt = _choose_batch_tile(N, C, HW, itemsize, vmem_tile_budget_bytes)
    N_pad = _round_up(N, Nt)

    x_flat = x.reshape(N, C, HW)
    if N_pad != N:
        x_flat = jnp.pad(x_flat, ((0, N_pad - N), (0, 0), (0, 0)))

    # Pre-transpose weights to (in_features, out_features) for row-major matmul.
    w1_t = w1.T                      # (C, hidden)
    w2_t = w2.T                      # (hidden, C)
    b1_2d = b1.reshape(1, hidden)
    b2_2d = b2.reshape(1, C)

    grid = (N_pad // Nt,)

    kernel = functools.partial(_se_kernel, inv_hw=float(1.0 / HW))

    bytes_x = N_pad * C * HW * itemsize
    cost = pl.CostEstimate(
        flops=2 * N_pad * C * HW + 4 * N_pad * C * hidden,
        transcendentals=N_pad * C,
        bytes_accessed=2 * bytes_x
        + N_pad * hidden * 4
        + (2 * C * hidden + C + hidden) * 4,
    )

    out1, out2_flat = pl.pallas_call(
        kernel,
        out_shape=(
            jax.ShapeDtypeStruct((N_pad, hidden), jnp.float32),
            jax.ShapeDtypeStruct((N_pad, C, HW), x.dtype),
        ),
        grid=grid,
        in_specs=[
            # Streamed, batch-tiled input (full C and HW per block -> fused SE).
            pl.BlockSpec((Nt, C, HW), lambda i: (i, 0, 0)),
            # Weights / biases: constant index_map -> stay VMEM-resident.
            pl.BlockSpec((C, hidden), lambda i: (0, 0)),
            pl.BlockSpec((1, hidden), lambda i: (0, 0)),
            pl.BlockSpec((hidden, C), lambda i: (0, 0)),
            pl.BlockSpec((1, C), lambda i: (0, 0)),
        ],
        out_specs=(
            pl.BlockSpec((Nt, hidden), lambda i: (i, 0)),
            pl.BlockSpec((Nt, C, HW), lambda i: (i, 0, 0)),
        ),
        compiler_params=pltpu.CompilerParams(
            dimension_semantics=("parallel",),   # megacore on v7x; no-op on v5e/v6e
            vmem_limit_bytes=48 * 1024 * 1024,   # safe on v7x (64 MiB physical)
        ),
        cost_estimate=cost,
    )(x_flat, w1_t, b1_2d, w2_t, b2_2d)

    out1 = out1[:N]
    out2 = out2_flat[:N].reshape(N, C, H, W)
    return out1, out2


if __name__ == "__main__":
    # Small shapes consistent with the module: N=2, C=8, H=W=16, ratio=0.5 -> hidden=4
    N, C, H, W = 2, 8, 16, 16
    ratio = 0.5
    hidden = int(ratio * C)

    key = jax.random.PRNGKey(0)
    kx, k1, k2, k3, k4 = jax.random.split(key, 5)

    x = jax.random.normal(kx, (N, C, H, W), dtype=jnp.float32)

    # Deterministic parameter init (PyTorch nn.Linear-style uniform bounds).
    bound1 = 1.0 / (C ** 0.5)
    w1 = jax.random.uniform(k1, (hidden, C), jnp.float32, -bound1, bound1)
    b1 = jax.random.uniform(k2, (hidden,), jnp.float32, -bound1, bound1)
    bound2 = 1.0 / (hidden ** 0.5)
    w2 = jax.random.uniform(k3, (C, hidden), jnp.float32, -bound2, bound2)
    b2 = jax.random.uniform(k4, (C,), jnp.float32, -bound2, bound2)

    out1, out2 = jax.jit(seq_ex_block)(x, w1, b1, w2, b2)
    jax.block_until_ready((out1, out2))

    # Lightweight correctness check against a plain-JAX reference.
    gap_ref = jnp.mean(x, axis=(2, 3))
    s1_ref = gap_ref @ w1.T + b1
    gate_ref = jax.nn.sigmoid(jnp.maximum(s1_ref, 0.0) @ w2.T + b2)
    out2_ref = x * gate_ref[:, :, None, None]
    assert jnp.allclose(out1, s1_ref, atol=1e-5), "output1 mismatch"
    assert jnp.allclose(out2, out2_ref, atol=1e-5), "output2 mismatch"

    print("KERNEL_OK")
</pallas_src>

<mosaic_0001>
module attributes {stable_mosaic.version = 11 : i64} {
  func.func @_se_kernel(%arg0: i32, %arg1: memref<8x8x256xf32, #tpu.memory_space<vmem>>, %arg2: memref<8x4xf32, #tpu.memory_space<vmem>>, %arg3: memref<1x4xf32, #tpu.memory_space<vmem>>, %arg4: memref<4x8xf32, #tpu.memory_space<vmem>>, %arg5: memref<1x8xf32, #tpu.memory_space<vmem>>, %arg6: memref<8x4xf32, #tpu.memory_space<vmem>>, %arg7: memref<8x8x256xf32, #tpu.memory_space<vmem>>) attributes {dimension_semantics = [#tpu.dimension_semantics<parallel>], iteration_bounds = array<i64: 1>, scalar_prefetch = 0 : i64, scratch_operands = 0 : i64, tpu.core_type = #tpu.core_type<tc>, window_params = [{transform_indices = @transform_0, window_bounds = array<i64: 8, 8, 256>}, {pipeline_mode = #tpu.pipeline_mode<synchronous>, transform_indices = @transform_1, window_bounds = array<i64: 8, 4>}, {pipeline_mode = #tpu.pipeline_mode<synchronous>, transform_indices = @transform_2, window_bounds = array<i64: 1, 4>}, {pipeline_mode = #tpu.pipeline_mode<synchronous>, transform_indices = @transform_3, window_bounds = array<i64: 4, 8>}, {pipeline_mode = #tpu.pipeline_mode<synchronous>, transform_indices = @transform_4, window_bounds = array<i64: 1, 8>}, {transform_indices = @transform_5, window_bounds = array<i64: 8, 4>}, {transform_indices = @transform_6, window_bounds = array<i64: 8, 8, 256>}]} {
    %c0 = arith.constant 0 : index
    %c0_0 = arith.constant 0 : index
    %c0_1 = arith.constant 0 : index
    %0 = vector.load %arg1[%c0, %c0_0, %c0_1] : memref<8x8x256xf32, #tpu.memory_space<vmem>>, vector<8x8x256xf32>
    %cst = arith.constant dense<0.000000e+00> : vector<8x8xf32>
    %1 = vector.multi_reduction <add>, %0, %cst [2] : vector<8x8x256xf32> to vector<8x8xf32>
    %cst_2 = arith.constant 3.906250e-03 : f32
    %2 = vector.broadcast %cst_2 : f32 to vector<8x8xf32>
    %3 = arith.mulf %1, %2 : vector<8x8xf32>
    %c0_3 = arith.constant 0 : index
    %c0_4 = arith.constant 0 : index
    %4 = vector.load %arg2[%c0_3, %c0_4] : memref<8x4xf32, #tpu.memory_space<vmem>>, vector<8x4xf32>
    %cst_5 = arith.constant dense<0.000000e+00> : vector<8x4xf32>
    %5 = tpu.matmul %3, %4, %cst_5 {dimension_numbers = #tpu.dot_dimension_numbers<[1], [0], [0], [1], [0, 0, 1, 1], [], []>} : vector<8x8xf32>, vector<8x4xf32>, vector<8x4xf32> -> vector<8x4xf32>
    %c0_6 = arith.constant 0 : index
    %c0_7 = arith.constant 0 : index
    %6 = vector.load %arg3[%c0_6, %c0_7] : memref<1x4xf32, #tpu.memory_space<vmem>>, vector<1x4xf32>
    %7 = vector.broadcast %6 : vector<1x4xf32> to vector<8x4xf32>
    %8 = arith.addf %5, %7 : vector<8x4xf32>
    %c0_8 = arith.constant 0 : index
    %c0_9 = arith.constant 0 : index
    %9 = vector.load %arg6[%c0_8, %c0_9] : memref<8x4xf32, #tpu.memory_space<vmem>>, vector<8x4xf32>
    tpu.vector_store %arg6[%c0_8, %c0_9], %8 {strides = array<i32>} : memref<8x4xf32, #tpu.memory_space<vmem>>, vector<8x4xf32>,
    %cst_10 = arith.constant 0.000000e+00 : f32
    %10 = vector.broadcast %cst_10 : f32 to vector<8x4xf32>
    %11 = arith.maximumf %8, %10 : vector<8x4xf32>
    %c0_11 = arith.constant 0 : index
    %c0_12 = arith.constant 0 : index
    %12 = vector.load %arg4[%c0_11, %c0_12] : memref<4x8xf32, #tpu.memory_space<vmem>>, vector<4x8xf32>
    %cst_13 = arith.constant dense<0.000000e+00> : vector<8x8xf32>
    %13 = tpu.matmul %11, %12, %cst_13 {dimension_numbers = #tpu.dot_dimension_numbers<[1], [0], [0], [1], [0, 0, 1, 1], [], []>} : vector<8x4xf32>, vector<4x8xf32>, vector<8x8xf32> -> vector<8x8xf32>
    %c0_14 = arith.constant 0 : index
    %c0_15 = arith.constant 0 : index
    %14 = vector.load %arg5[%c0_14, %c0_15] : memref<1x8xf32, #tpu.memory_space<vmem>>, vector<1x8xf32>
    %15 = vector.broadcast %14 : vector<1x8xf32> to vector<8x8xf32>
    %16 = arith.addf %13, %15 : vector<8x8xf32>
    %17 = arith.negf %16 : vector<8x8xf32>
    %18 = math.exp %17 : vector<8x8xf32>
    %cst_16 = arith.constant 1.000000e+00 : f32
    %19 = vector.broadcast %cst_16 : f32 to vector<8x8xf32>
    %20 = arith.addf %19, %18 : vector<8x8xf32>
    %21 = arith.divf %19, %20 : vector<8x8xf32>
    %22 = vector.shape_cast %21 : vector<8x8xf32> to vector<8x8x1xf32>
    %23 = vector.broadcast %22 : vector<8x8x1xf32> to vector<8x8x256xf32>
    %24 = arith.mulf %0, %23 : vector<8x8x256xf32>
    %c0_17 = arith.constant 0 : index
    %c0_18 = arith.constant 0 : index
    %c0_19 = arith.constant 0 : index
    %25 = vector.load %arg7[%c0_17, %c0_18, %c0_19] : memref<8x8x256xf32, #tpu.memory_space<vmem>>, vector<8x8x256xf32>
    tpu.vector_store %arg7[%c0_17, %c0_18, %c0_19], %24 {strides = array<i32>} : memref<8x8x256xf32, #tpu.memory_space<vmem>>, vector<8x8x256xf32>,
    return
  }
  func.func @transform_0(%arg0: i32) -> (i32, i32, i32) {
    %c0_i32 = arith.constant 0 : i32
    %c0_i32_0 = arith.constant 0 : i32
    %c0_i32_1 = arith.constant 0 : i32
    return %arg0, %c0_i32, %c0_i32_0 : i32, i32, i32
  }
  func.func @transform_1(%arg0: i32) -> (i32, i32) {
    %c0_i32 = arith.constant 0 : i32
    %c0_i32_0 = arith.constant 0 : i32
    %c0_i32_1 = arith.constant 0 : i32
    return %c0_i32, %c0_i32_0 : i32, i32
  }
  func.func @transform_2(%arg0: i32) -> (i32, i32) {
    %c0_i32 = arith.constant 0 : i32
    %c0_i32_0 = arith.constant 0 : i32
    %c0_i32_1 = arith.constant 0 : i32
    return %c0_i32, %c0_i32_0 : i32, i32
  }
  func.func @transform_3(%arg0: i32) -> (i32, i32) {
    %c0_i32 = arith.constant 0 : i32
    %c0_i32_0 = arith.constant 0 : i32
    %c0_i32_1 = arith.constant 0 : i32
    return %c0_i32, %c0_i32_0 : i32, i32
  }
  func.func @transform_4(%arg0: i32) -> (i32, i32) {
    %c0_i32 = arith.constant 0 : i32
    %c0_i32_0 = arith.constant 0 : i32
    %c0_i32_1 = arith.constant 0 : i32
    return %c0_i32, %c0_i32_0 : i32, i32
  }
  func.func @transform_5(%arg0: i32) -> (i32, i32) {
    %c0_i32 = arith.constant 0 : i32
    %c0_i32_0 = arith.constant 0 : i32
    return %arg0, %c0_i32 : i32, i32
  }
  func.func @transform_6(%arg0: i32) -> (i32, i32, i32) {
    %c0_i32 = arith.constant 0 : i32
    %c0_i32_0 = arith.constant 0 : i32
    %c0_i32_1 = arith.constant 0 : i32
    return %arg0, %c0_i32, %c0_i32_0 : i32, i32, i32
  }
}

</mosaic_0001>

<bundles_post_ra>
// kernel: seq_ex_block.1
= control target key start
LH: loop header
LB: loop body
LE: loop exit
PB: predicated region body
PF: predicated region fallthrough
CT: control target
= control target key end

     0   :  { %v423_v24 = vmov 0.0   ;;  %vm424_vm0 = vmmov 0   ;;  %v86_v26 = vlaneseq  ;;  %vm120_vm1 = vcmask 1041409   ;;  %s646_s0 = inlined_call_operand.vmem [shape: f32[8,8,256], index: 0, kind: input, shape index: {}]   ;;  %s647_s1 = inlined_call_operand.vmem [shape: f32[8,4], index: 1, kind: input, shape index: {}]   ;;  %s648_s3 = inlined_call_operand.vmem [shape: f32[4,8], index: 3, kind: input, shape index: {}]   ;;  %s649_s2 = inlined_call_operand.vmem [shape: f32[1,4], index: 2, kind: input, shape index: {}]   ;;  %s650_s5 = inlined_call_operand.vmem [shape: f32[8,4], index: 5, kind: output, shape index: {0}]   ;;  %s651_s4 = inlined_call_operand.vmem [shape: f32[1,8], index: 4, kind: input, shape index: {}]   ;;  %s652_s6 = inlined_call_operand.vmem [shape: f32[8,8,256], index: 6, kind: output, shape index: {1}]  }
   0x1   :  { %v463_v0 = vld [vmem:[%s646_s0] sm:$0xff]  ;;  %v468_v1 = vld [vmem:[%s646_s0 + $0x8] sm:$0xff]  ;;  %v485_v5 = vld [vmem:[%s646_s0 + $0x10] sm:$0xff]  ;;  %407 = vmatprep.subr.mxu0 %v423_v24  ;;  %409 = vmatprep.mubr.msk.f32.mxu0 %vm424_vm0, %v423_v24  ;;  %vm122_vm2 = vcmask 1042434   ;;  %vm124_vm3 = vcmask 1043459   ;;  %vm126_vm4 = vcmask 1044484  }
   0x2   :  { %v473_v2 = vld [vmem:[%s646_s0 + $0x20] sm:$0xff]  ;;  %v38_v3 = vadd.f32 %v468_v1, %v463_v0  ;;  %v480_v4 = vld [vmem:[%s646_s0 + $0x28] sm:$0xff]  ;;  %v490_v6 = vld [vmem:[%s646_s0 + $0x18] sm:$0xff]  ;;  %412 = vmatprep.subr.mxu1 %v423_v24  ;;  %414 = vmatprep.mubr.msk.f32.mxu1 %vm424_vm0, %v423_v24  ;;  %v87_v27 = vand.u32 127, %v86_v26  ;;  %v559_v28 = vshrl.u32 %v86_v26, 7  ;;  %vm128_vm5 = vcmask 1045509  }
   0x3   :  { %v44_v7 = vadd.f32 %v480_v4, %v473_v2  ;;  %v497_v8 = vld [vmem:[%s646_s0 + $0x30] sm:$0xff]  ;;  %v502_v9 = vld [vmem:[%s646_s0 + $0x38] sm:$0xff]  ;;  %v41_v10 = vadd.f32 %v490_v6, %v485_v5  ;;  %v511_v12 = vld [vmem:[%s646_s0 + $0x40] sm:$0xff]  ;;  %vm130_vm6 = vcmask 1046534   ;;  %vm132_vm7 = vcmask 1047559  }
   0x4   :  { %39 = vadd.xlane.f32.xlu0 %v38_v3  ;;  %v47_v11 = vadd.f32 %v502_v9, %v497_v8  ;;  %v516_v13 = vld [vmem:[%s646_s0 + $0x48] sm:$0xff]  ;;  %v521_v14 = vld [vmem:[%s646_s0 + $0x50] sm:$0xff]  ;;  %v526_v15 = vld [vmem:[%s646_s0 + $0x58] sm:$0xff]  ;;  %v90_v31 = vsub.s32 %v87_v27, %v559_v28  ;;  %vm134_vm8 = vcmask 64512   ;;  %vm221_vm9 = vcmask 1043456  }
   0x5   :  { %45 = vadd.xlane.f32.xlu1 %v44_v7  ;;  %v50_v16 = vadd.f32 %v516_v13, %v511_v12  ;;  %v53_v17 = vadd.f32 %v526_v15, %v521_v14  ;;  %v535_v18 = vld [vmem:[%s646_s0 + $0x60] sm:$0xff]  ;;  %v540_v19 = vld [vmem:[%s646_s0 + $0x68] sm:$0xff]  ;;  %v545_v20 = vld [vmem:[%s646_s0 + $0x70] sm:$0xff]  ;;  %vm207_vm10 = vcmask 31744   ;;  %v310_v26 = vsub.s32 1, %v559_v28 }
   0x6   :  { %v550_v21 = vld [vmem:[%s646_s0 + $0x78] sm:$0xff]  ;;  %v56_v22 = vadd.f32 %v540_v19, %v535_v18  ;;  %v70_v25 = vld [vmem:[%s647_s1] sm:$0xff]  ;;  %v303_v27 = vsub.s32 0, %v559_v28 }
   0x7   :  { %v59_v23 = vadd.f32 %v550_v21, %v545_v20  ;;  %408 = vmatpush3.msra.mxu0 %v70_v25  ;;  %v210_v61 = vld [vmem:[%s648_s3] sm:$0xf] }
   0x8   :  { %42 = vadd.xlane.f32.xlu0 %v41_v10  ;;  %413 = vmatpush3.msk.msra.mxu1 %vm221_vm9, %v210_v61  ;;  %v397_v62 = vld [vmem:[%s649_s2] ss:$0 sm:$0xff] }
   0x9   :  { %48 = vadd.xlane.f32.xlu1 %v47_v11  ;;  %v399_v11 = vld [vmem:[%s651_s4] ss:$0 sm:$0xff] }
   0xc   :  { %51 = vadd.xlane.f32.xlu0 %v50_v16 }
   0xd   :  { %54 = vadd.xlane.f32.xlu1 %v53_v17 }
  0x10   :  { %57 = vadd.xlane.f32.xlu0 %v56_v22 }
  0x11   :  { %60 = vadd.xlane.f32.xlu1 %v59_v23 }
  0x8d   :  { %v40_v29 = vpop.xlane.xlu0 %39 }
  0x8e   :  { %v46_v30 = vpop.xlane.xlu1 %45  ;;  %v62_v32 = vmul.f32 0.00390625, %v40_v29 }
  0x8f   :  { %v64_v33 = vmul.f32 0.00390625, %v46_v30 }
  0x90   :  { %v91_v38 = vrot.slane %v62_v32, %v90_v31  ;;  %v317_v32 = vsub.s32 2, %v559_v28 }
  0x91   :  { %v43_v34 = vpop.xlane.xlu0 %42  ;;  %v99_v40 = vrot.slane %v64_v33, %v90_v31  ;;  %v331_v33 = vsub.s32 4, %v559_v28 }
  0x92   :  { %v63_v35 = vmul.f32 0.00390625, %v43_v34  ;;  %v49_v36 = vpop.xlane.xlu1 %48 }
  0x93   :  { %v65_v37 = vmul.f32 0.00390625, %v49_v36  ;;  %v324_v36 = vsub.s32 3, %v559_v28 }
  0x94   :  { %v95_v39 = vrot.slane %v63_v35, %v90_v31 }
  0x95   :  { %v103_v41 = vrot.slane %v65_v37, %v90_v31  ;;  %v52_v42 = vpop.xlane.xlu0 %51  ;;  %v345_v37 = vsub.s32 6, %v559_v28 }
  0x96   :  { %v121_v43 = vsel %vm120_vm1, %v95_v39, %v91_v38  ;;  %v66_v44 = vmul.f32 0.00390625, %v52_v42  ;;  %v55_v45 = vpop.xlane.xlu1 %54  ;;  %v352_v42 = vsub.s32 7, %v559_v28 }
  0x97   :  { %v123_v46 = vsel %vm122_vm2, %v99_v40, %v121_v43  ;;  %v67_v47 = vmul.f32 0.00390625, %v55_v45  ;;  %v338_v40 = vsub.s32 5, %v559_v28 }
  0x98   :  { %v125_v48 = vsel %vm124_vm3, %v103_v41, %v123_v46  ;;  %v107_v49 = vrot.slane %v66_v44, %v90_v31 }
  0x99   :  { %v111_v50 = vrot.slane %v67_v47, %v90_v31  ;;  %v58_v51 = vpop.xlane.xlu0 %57 }
  0x9a   :  { %v127_v52 = vsel %vm126_vm4, %v107_v49, %v125_v48  ;;  %v68_v53 = vmul.f32 0.00390625, %v58_v51  ;;  %v61_v54 = vpop.xlane.xlu1 %60 }
  0x9b   :  { %v69_v55 = vmul.f32 0.00390625, %v61_v54  ;;  %v129_v57 = vsel %vm128_vm5, %v111_v50, %v127_v52 }
  0x9c   :  { %v115_v56 = vrot.slane %v68_v53, %v90_v31 }
  0x9d   :  { %v119_v58 = vrot.slane %v69_v55, %v90_v31 }
  0x9e   :  { %v131_v59 = vsel %vm130_vm6, %v115_v56, %v129_v57 }
  0x9f   :  { %v133_v60 = vsel %vm132_vm7, %v119_v58, %v131_v59 }
  0xa0   :  { %410 = vmatmul.mubr.msk.f32.vlgmr.msra.gmra.mxu0 %vm134_vm8, %v133_v60 }
 0x160   :  { %v203_v63 = vpop.f32.mrf.mxu0 }
 0x161   :  { %v204_v3 = vadd.f32 %v397_v62, %v203_v63 }
 0x162   :  { %v411_v7 = vpop.f32.mrf.mxu0 }
 0x163   :  { %v209_v10 = vmax.f32 %v204_v3, 0.0  ;;  %208 = vst.msk [vmem:[%s650_s5] sm:$0xff] %vm207_vm10, %v204_v3 }
 0x165   :  { %415 = vmatmul.mubr.msk.f32.vlgmr.msra.gmra.mxu1 %vm207_vm10, %v209_v10 }
 0x225   :  { %v291_v16 = vpop.f32.mrf.mxu1 }
 0x226   :  { %v292_v17 = vadd.f32 %v399_v11, %v291_v16 }
 0x227   :  { %v416_v22 = vpop.f32.mrf.mxu1 }
 0x228   :  { %v402_v23 = vmul.f32 -1.442695, %v292_v17 }
 0x22a   :  { %419 = vpow2.f32 %v402_v23 }
 0x237   :  { %v420_v24 = vpop.eup %419 }
 0x238   :  { %v298_v25 = vadd.f32 1.0, %v420_v24 }
 0x23a   :  { %421 = vrcp.f32 %v298_v25 }
 0x247   :  { %v422_v29 = vpop.eup %421 }
 0x248   :  { %v311_v30 = vrot.slane %v422_v29, %v310_v26  ;;  %v304_v31 = vrot.slane %v422_v29, %v303_v27  ;;  %v318_v34 = vrot.slane %v422_v29, %v317_v32  ;;  %v332_v35 = vrot.slane %v422_v29, %v331_v33 }
 0x249   :  { %v325_v38 = vrot.slane %v422_v29, %v324_v36  ;;  %v346_v39 = vrot.slane %v422_v29, %v345_v37  ;;  %v339_v41 = vrot.slane %v422_v29, %v338_v40  ;;  %v353_v43 = vrot.slane %v422_v29, %v352_v42 }
 0x24a   :  { %313 = vbcast.lane.b32.xlu1 %v311_v30, 256  ;;  %306 = vbcast.lane.b32.xlu0 %v304_v31, 256 }
 0x24e   :  { %320 = vbcast.lane.b32.xlu1 %v318_v34, 256  ;;  %334 = vbcast.lane.b32.xlu0 %v332_v35, 256 }
 0x252   :  { %327 = vbcast.lane.b32.xlu1 %v325_v38, 256  ;;  %348 = vbcast.lane.b32.xlu0 %v346_v39, 256 }
 0x256   :  { %341 = vbcast.lane.b32.xlu1 %v339_v41, 256 }
 0x25a   :  { %355 = vbcast.lane.b32.xlu1 %v353_v43, 256 }
 0x2bc   :  { %v314_v44 = vpop.permute.xlu1 %313  ;;  %v307_v45 = vpop.permute.xlu0 %306 }
 0x2bd   :  { %v359_v46 = vmul.f32 %v314_v44, %v485_v5  ;;  %v360_v47 = vmul.f32 %v314_v44, %v490_v6  ;;  %v357_v48 = vmul.f32 %v307_v45, %v463_v0  ;;  %v358_v49 = vmul.f32 %v307_v45, %v468_v1 }
 0x2bf   :  { %375 = vst [vmem:[%s652_s6 + $0x10] sm:$0xff] %v359_v46  ;;  %376 = vst [vmem:[%s652_s6 + $0x18] sm:$0xff] %v360_v47 }
 0x2c0   :  { %373 = vst [vmem:[%s652_s6] sm:$0xff] %v357_v48  ;;  %374 = vst [vmem:[%s652_s6 + $0x8] sm:$0xff] %v358_v49  ;;  %v321_v5 = vpop.permute.xlu1 %320  ;;  %v335_v0 = vpop.permute.xlu0 %334 }
 0x2c1   :  { %v361_v1 = vmul.f32 %v321_v5, %v473_v2  ;;  %v362_v6 = vmul.f32 %v321_v5, %v480_v4  ;;  %v365_v28 = vmul.f32 %v335_v0, %v511_v12  ;;  %v366_v50 = vmul.f32 %v335_v0, %v516_v13 }
 0x2c3   :  { %377 = vst [vmem:[%s652_s6 + $0x20] sm:$0xff] %v361_v1  ;;  %378 = vst [vmem:[%s652_s6 + $0x28] sm:$0xff] %v362_v6 }
 0x2c4   :  { %381 = vst [vmem:[%s652_s6 + $0x40] sm:$0xff] %v365_v28  ;;  %382 = vst [vmem:[%s652_s6 + $0x48] sm:$0xff] %v366_v50  ;;  %v328_v2 = vpop.permute.xlu1 %327  ;;  %v349_v4 = vpop.permute.xlu0 %348 }
 0x2c5   :  { %v363_v12 = vmul.f32 %v328_v2, %v497_v8  ;;  %v364_v13 = vmul.f32 %v328_v2, %v502_v9  ;;  %v369_v51 = vmul.f32 %v349_v4, %v535_v18  ;;  %v370_v52 = vmul.f32 %v349_v4, %v540_v19 }
 0x2c7   :  { %379 = vst [vmem:[%s652_s6 + $0x30] sm:$0xff] %v363_v12  ;;  %380 = vst [vmem:[%s652_s6 + $0x38] sm:$0xff] %v364_v13 }
 0x2c8   :  { %385 = vst [vmem:[%s652_s6 + $0x60] sm:$0xff] %v369_v51  ;;  %386 = vst [vmem:[%s652_s6 + $0x68] sm:$0xff] %v370_v52  ;;  %v342_v8 = vpop.permute.xlu1 %341 }
 0x2c9   :  { %v367_v9 = vmul.f32 %v342_v8, %v521_v14  ;;  %v368_v18 = vmul.f32 %v342_v8, %v526_v15 }
 0x2cb   :  { %383 = vst [vmem:[%s652_s6 + $0x50] sm:$0xff] %v367_v9  ;;  %384 = vst [vmem:[%s652_s6 + $0x58] sm:$0xff] %v368_v18 }
 0x2cc   :  { %v356_v19 = vpop.permute.xlu1 %355 }
 0x2cd   :  { %v371_v53 = vmul.f32 %v356_v19, %v545_v20  ;;  %v372_v54 = vmul.f32 %v356_v19, %v550_v21 }
 0x2cf   :  { %387 = vst [vmem:[%s652_s6 + $0x70] sm:$0xff] %v371_v53  ;;  %388 = vst [vmem:[%s652_s6 + $0x78] sm:$0xff] %v372_v54 }

</bundles_post_ra>
